<compile_context>
chip_gen: v6e
topology: v6e:2x2x1
jax: 0.10.0
libtpu: 0.0.40
codegen_flags: <defaults>
</compile_context>

<pallas_src>
import jax
import jax.numpy as jnp
from jax.experimental import pallas as pl
from jax.experimental.pallas import tpu as pltpu


def _fv_elementwise_kernel(xi_ref, xf_ref, m_ref, o_ref):
    # xi_ref: (TB, TI, D)    x[b-tile, i-tile, :]          (i-indexed factor)
    # xf_ref: (TB, F,  D)    x[b-tile, :, :]               (j-indexed factor)
    # m_ref : (TI, F,  D)    masked (triu) matrix rows for the i-tile
    # o_ref : (TB, TI, F*D)  lane-dense output block
    F = m_ref.shape[1]
    D = m_ref.shape[2]
    xi = xi_ref[...]                                    # (TB, TI, D)
    # Static unroll over j: per-j work is a (TB, TI, D) fused multiply chain plus
    # a static-offset lane-slice store -- no output-sized temporary is built.
    for j in range(F):
        mj = m_ref[:, j, :]                             # (TI, D)
        xj = xf_ref[:, j, :]                            # (TB, D)
        val = mj[None, :, :] * xi * xj[:, None, :]      # (TB, TI, D)
        o_ref[:, :, j * D:(j + 1) * D] = val.astype(o_ref.dtype)


def _default_out_block_bytes():
    """Generation-aware output-block target (store-bound kernel)."""
    try:
        kind = jax.devices()[0].device_kind.lower()
    except Exception:
        return 2 << 20
    if "7x" in kind or "v7" in kind:
        return 6 << 20        # higher HBM BW -> bigger blocks to hide step overhead
    if "v6" in kind:
        return 4 << 20
    return 2 << 20            # v5e / others: 2 MiB already ~85% of roofline


def _pick_ti(F, target):
    """Largest divisor of F that is == F or a multiple of 8 and <= target."""
    cands = [d for d in range(1, F + 1) if F % d == 0 and (d == F or d % 8 == 0)]
    fit = [d for d in cands if d <= target]
    return max(fit) if fit else min(cands)


def _pick_tb(B, target):
    """Largest divisor of B that is <= target (TB is never a minor block dim)."""
    target = max(1, min(B, target))
    return max(d for d in range(1, B + 1) if B % d == 0 and d <= target)


def fv_elementwise_transform(x, matrix, *, out_block_bytes=None, out_dtype=None):
    """x: (B, F, D), matrix: (F, F, D) -> (B, F, F, D) masked pairwise products."""
    B, F, D = x.shape
    assert matrix.shape == (F, F, D)
    FD = F * D
    out_dtype = x.dtype if out_dtype is None else jnp.dtype(out_dtype)
    in_itemsize = jnp.dtype(x.dtype).itemsize
    out_itemsize = jnp.dtype(out_dtype).itemsize
    if out_block_bytes is None:
        out_block_bytes = _default_out_block_bytes()

    # Hoisted constant work: strict-upper-triangular mask applied once (XLA side).
    mask = jnp.triu(jnp.ones((F, F), dtype=matrix.dtype), 1)[:, :, None]
    masked = mask * matrix                              # (F, F, D)

    # ---- tile selection: budget TB >= 8 first, then maximize TI, then refill TB.
    # Note: if FD is not a multiple of 128 the (full-width) output stores fall
    # back to masked vst; pad D upstream if profiles show that tail dominating.
    row_bytes = FD * out_itemsize
    tb_floor = min(B, 8)
    ti_target = max(1, out_block_bytes // max(tb_floor * row_bytes, 1))
    TI = _pick_ti(F, ti_target)
    tb_target = max(1, out_block_bytes // max(TI * row_bytes, 1))
    TB = _pick_tb(B, tb_target)
    n_b, n_i = B // TB, F // TI

    # Double-buffered per-step VMEM footprint -> explicit scoped-VMEM limit
    # (kept well under the v7x 64 MiB physical budget).
    footprint = (2 * (TB * TI * D + TB * F * D + TI * F * D) * in_itemsize
                 + 2 * TB * TI * FD * out_itemsize)
    vmem_limit = int(min(max(2 * footprint + (4 << 20), 16 << 20), 48 << 20))

    cost = pl.CostEstimate(
        flops=2 * B * F * FD,                           # 2 muls per output element
        transcendentals=0,
        bytes_accessed=(B * F * FD * out_itemsize        # output stream (dominant)
                        + (2 * B * F * D                 # xi + xf reads of x
                           + n_b * F * FD) * in_itemsize),  # masked matrix re-reads
    )

    out_flat = pl.pallas_call(
        _fv_elementwise_kernel,
        out_shape=jax.ShapeDtypeStruct((B, F, FD), out_dtype),
        grid_spec=pltpu.PrefetchScalarGridSpec(
            num_scalar_prefetch=0,
            grid=(n_b, n_i),                            # batch outer (megacore), i inner
            in_specs=[
                pl.BlockSpec((TB, TI, D), lambda b, i: (b, i, 0)),   # x[b-tile, i-tile, :]
                pl.BlockSpec((TB, F, D), lambda b, i: (b, 0, 0)),    # x[b-tile, :, :]
                pl.BlockSpec((TI, F, D), lambda b, i: (i, 0, 0)),    # masked matrix rows
            ],
            out_specs=pl.BlockSpec((TB, TI, FD), lambda b, i: (b, i, 0)),
        ),
        compiler_params=pltpu.CompilerParams(
            dimension_semantics=("parallel", "parallel"),
            vmem_limit_bytes=vmem_limit,
        ),
        cost_estimate=cost,
    )(x, x, masked)

    return out_flat.reshape(B, F, F, D)


def _reference(x, matrix):
    B, F, D = x.shape
    mask = jnp.triu(jnp.ones((F, F), dtype=x.dtype), 1)[:, :, None]   # (F, F, 1)
    masked = mask * matrix                                            # (F, F, D)
    weight = masked[None, :, :, :]                                    # (1, F, F, D)
    _input = x[:, :, None, :]                                         # (B, F, 1, D)
    ori = x[:, None, :, :]                                            # (B, 1, F, D)
    return _input * weight * ori                                      # (B, F, F, D)


if __name__ == "__main__":
    B, F, D = 2, 4, 32   # batch, featureNumb, dim

    key = jax.random.PRNGKey(0)
    kx, km = jax.random.split(key)
    x = jax.random.normal(kx, (B, F, D), dtype=jnp.float32)
    # Parameter init: normal(mean=0, std=0.001), shape (featureNumb, featureNumb, dim)
    matrix = 0.001 * jax.random.normal(km, (F, F, D), dtype=jnp.float32)

    out = fv_elementwise_transform(x, matrix)
    out = jax.block_until_ready(out)

    ref = _reference(x, matrix)
    assert out.shape == (B, F, F, D)
    assert jnp.allclose(out, ref, atol=1e-6, rtol=1e-6)

    print("KERNEL_OK")
</pallas_src>

<mosaic_0001>
module attributes {stable_mosaic.version = 11 : i64} {
  func.func @_fv_elementwise_kernel(%arg0: i32, %arg1: i32, %arg2: memref<2x4x32xf32, #tpu.memory_space<vmem>>, %arg3: memref<2x4x32xf32, #tpu.memory_space<vmem>>, %arg4: memref<4x4x32xf32, #tpu.memory_space<vmem>>, %arg5: memref<2x4x128xf32, #tpu.memory_space<vmem>>) attributes {dimension_semantics = [#tpu.dimension_semantics<parallel>, #tpu.dimension_semantics<parallel>], iteration_bounds = array<i64: 1, 1>, scalar_prefetch = 0 : i64, scratch_operands = 0 : i64, tpu.core_type = #tpu.core_type<tc>, window_params = [{transform_indices = @transform_0, window_bounds = array<i64: 2, 4, 32>}, {transform_indices = @transform_1, window_bounds = array<i64: 2, 4, 32>}, {transform_indices = @transform_2, window_bounds = array<i64: 4, 4, 32>}, {transform_indices = @transform_3, window_bounds = array<i64: 2, 4, 128>}]} {
    %c0 = arith.constant 0 : index
    %c0_0 = arith.constant 0 : index
    %c0_1 = arith.constant 0 : index
    %0 = vector.load %arg2[%c0, %c0_0, %c0_1] : memref<2x4x32xf32, #tpu.memory_space<vmem>>, vector<2x4x32xf32>
    %c0_2 = arith.constant 0 : index
    %c0_3 = arith.constant 0 : index
    %c0_4 = arith.constant 0 : index
    %1 = vector.load %arg4[%c0_2, %c0_3, %c0_4] : memref<4x4x32xf32, #tpu.memory_space<vmem>>, vector<4x1x32xf32>
    %2 = vector.shape_cast %1 : vector<4x1x32xf32> to vector<4x32xf32>
    %c0_5 = arith.constant 0 : index
    %c0_6 = arith.constant 0 : index
    %c0_7 = arith.constant 0 : index
    %3 = vector.load %arg3[%c0_5, %c0_6, %c0_7] : memref<2x4x32xf32, #tpu.memory_space<vmem>>, vector<2x1x32xf32>
    %4 = vector.shape_cast %3 : vector<2x1x32xf32> to vector<2x32xf32>
    %5 = vector.shape_cast %2 : vector<4x32xf32> to vector<1x4x32xf32>
    %6 = vector.broadcast %5 : vector<1x4x32xf32> to vector<2x4x32xf32>
    %7 = arith.mulf %6, %0 : vector<2x4x32xf32>
    %8 = vector.shape_cast %4 : vector<2x32xf32> to vector<2x1x32xf32>
    %9 = vector.broadcast %8 : vector<2x1x32xf32> to vector<2x4x32xf32>
    %10 = arith.mulf %7, %9 : vector<2x4x32xf32>
    %c0_8 = arith.constant 0 : index
    %c0_9 = arith.constant 0 : index
    %c0_10 = arith.constant 0 : index
    %11 = vector.load %arg5[%c0_8, %c0_9, %c0_10] : memref<2x4x128xf32, #tpu.memory_space<vmem>>, vector<2x4x32xf32>
    tpu.vector_store %arg5[%c0_8, %c0_9, %c0_10], %10 {strides = array<i32>} : memref<2x4x128xf32, #tpu.memory_space<vmem>>, vector<2x4x32xf32>,
    %c0_11 = arith.constant 0 : index
    %c1 = arith.constant 1 : index
    %c0_12 = arith.constant 0 : index
    %12 = vector.load %arg4[%c0_11, %c1, %c0_12] : memref<4x4x32xf32, #tpu.memory_space<vmem>>, vector<4x1x32xf32>
    %13 = vector.shape_cast %12 : vector<4x1x32xf32> to vector<4x32xf32>
    %c0_13 = arith.constant 0 : index
    %c1_14 = arith.constant 1 : index
    %c0_15 = arith.constant 0 : index
    %14 = vector.load %arg3[%c0_13, %c1_14, %c0_15] : memref<2x4x32xf32, #tpu.memory_space<vmem>>, vector<2x1x32xf32>
    %15 = vector.shape_cast %14 : vector<2x1x32xf32> to vector<2x32xf32>
    %16 = vector.shape_cast %13 : vector<4x32xf32> to vector<1x4x32xf32>
    %17 = vector.broadcast %16 : vector<1x4x32xf32> to vector<2x4x32xf32>
    %18 = arith.mulf %17, %0 : vector<2x4x32xf32>
    %19 = vector.shape_cast %15 : vector<2x32xf32> to vector<2x1x32xf32>
    %20 = vector.broadcast %19 : vector<2x1x32xf32> to vector<2x4x32xf32>
    %21 = arith.mulf %18, %20 : vector<2x4x32xf32>
    %c0_16 = arith.constant 0 : index
    %c0_17 = arith.constant 0 : index
    %c32 = arith.constant 32 : index
    %22 = vector.load %arg5[%c0_16, %c0_17, %c32] : memref<2x4x128xf32, #tpu.memory_space<vmem>>, vector<2x4x32xf32>
    tpu.vector_store %arg5[%c0_16, %c0_17, %c32], %21 {strides = array<i32>} : memref<2x4x128xf32, #tpu.memory_space<vmem>>, vector<2x4x32xf32>,
    %c0_18 = arith.constant 0 : index
    %c2 = arith.constant 2 : index
    %c0_19 = arith.constant 0 : index
    %23 = vector.load %arg4[%c0_18, %c2, %c0_19] : memref<4x4x32xf32, #tpu.memory_space<vmem>>, vector<4x1x32xf32>
    %24 = vector.shape_cast %23 : vector<4x1x32xf32> to vector<4x32xf32>
    %c0_20 = arith.constant 0 : index
    %c2_21 = arith.constant 2 : index
    %c0_22 = arith.constant 0 : index
    %25 = vector.load %arg3[%c0_20, %c2_21, %c0_22] : memref<2x4x32xf32, #tpu.memory_space<vmem>>, vector<2x1x32xf32>
    %26 = vector.shape_cast %25 : vector<2x1x32xf32> to vector<2x32xf32>
    %27 = vector.shape_cast %24 : vector<4x32xf32> to vector<1x4x32xf32>
    %28 = vector.broadcast %27 : vector<1x4x32xf32> to vector<2x4x32xf32>
    %29 = arith.mulf %28, %0 : vector<2x4x32xf32>
    %30 = vector.shape_cast %26 : vector<2x32xf32> to vector<2x1x32xf32>
    %31 = vector.broadcast %30 : vector<2x1x32xf32> to vector<2x4x32xf32>
    %32 = arith.mulf %29, %31 : vector<2x4x32xf32>
    %c0_23 = arith.constant 0 : index
    %c0_24 = arith.constant 0 : index
    %c64 = arith.constant 64 : index
    %33 = vector.load %arg5[%c0_23, %c0_24, %c64] : memref<2x4x128xf32, #tpu.memory_space<vmem>>, vector<2x4x32xf32>
    tpu.vector_store %arg5[%c0_23, %c0_24, %c64], %32 {strides = array<i32>} : memref<2x4x128xf32, #tpu.memory_space<vmem>>, vector<2x4x32xf32>,
    %c0_25 = arith.constant 0 : index
    %c3 = arith.constant 3 : index
    %c0_26 = arith.constant 0 : index
    %34 = vector.load %arg4[%c0_25, %c3, %c0_26] : memref<4x4x32xf32, #tpu.memory_space<vmem>>, vector<4x1x32xf32>
    %35 = vector.shape_cast %34 : vector<4x1x32xf32> to vector<4x32xf32>
    %c0_27 = arith.constant 0 : index
    %c3_28 = arith.constant 3 : index
    %c0_29 = arith.constant 0 : index
    %36 = vector.load %arg3[%c0_27, %c3_28, %c0_29] : memref<2x4x32xf32, #tpu.memory_space<vmem>>, vector<2x1x32xf32>
    %37 = vector.shape_cast %36 : vector<2x1x32xf32> to vector<2x32xf32>
    %38 = vector.shape_cast %35 : vector<4x32xf32> to vector<1x4x32xf32>
    %39 = vector.broadcast %38 : vector<1x4x32xf32> to vector<2x4x32xf32>
    %40 = arith.mulf %39, %0 : vector<2x4x32xf32>
    %41 = vector.shape_cast %37 : vector<2x32xf32> to vector<2x1x32xf32>
    %42 = vector.broadcast %41 : vector<2x1x32xf32> to vector<2x4x32xf32>
    %43 = arith.mulf %40, %42 : vector<2x4x32xf32>
    %c0_30 = arith.constant 0 : index
    %c0_31 = arith.constant 0 : index
    %c96 = arith.constant 96 : index
    %44 = vector.load %arg5[%c0_30, %c0_31, %c96] : memref<2x4x128xf32, #tpu.memory_space<vmem>>, vector<2x4x32xf32>
    tpu.vector_store %arg5[%c0_30, %c0_31, %c96], %43 {strides = array<i32>} : memref<2x4x128xf32, #tpu.memory_space<vmem>>, vector<2x4x32xf32>,
    return
  }
  func.func @transform_0(%arg0: i32, %arg1: i32) -> (i32, i32, i32) {
    %c0_i32 = arith.constant 0 : i32
    %c0_i32_0 = arith.constant 0 : i32
    return %arg0, %arg1, %c0_i32 : i32, i32, i32
  }
  func.func @transform_1(%arg0: i32, %arg1: i32) -> (i32, i32, i32) {
    %c0_i32 = arith.constant 0 : i32
    %c0_i32_0 = arith.constant 0 : i32
    %c0_i32_1 = arith.constant 0 : i32
    return %arg0, %c0_i32, %c0_i32_0 : i32, i32, i32
  }
  func.func @transform_2(%arg0: i32, %arg1: i32) -> (i32, i32, i32) {
    %c0_i32 = arith.constant 0 : i32
    %c0_i32_0 = arith.constant 0 : i32
    %c0_i32_1 = arith.constant 0 : i32
    return %arg1, %c0_i32, %c0_i32_0 : i32, i32, i32
  }
  func.func @transform_3(%arg0: i32, %arg1: i32) -> (i32, i32, i32) {
    %c0_i32 = arith.constant 0 : i32
    %c0_i32_0 = arith.constant 0 : i32
    return %arg0, %arg1, %c0_i32 : i32, i32, i32
  }
}

</mosaic_0001>

<bundles_post_ra>
// kernel: tpu_custom_call.1
= control target key start
LH: loop header
LB: loop body
LE: loop exit
PB: predicated region body
PF: predicated region fallthrough
CT: control target
= control target key end

     0   :  { %8 = vsyncpa [#allocation3], 0  ;;  %s563_s0 = inlined_call_operand.hbm [shape: f32[2,4,32], index: 0, kind: input, shape index: {}]   ;;  %s564_s1 = inlined_call_operand.hbm [shape: f32[2,4,32], index: 1, kind: input, shape index: {}]   ;;  %s565_s2 = inlined_call_operand.hbm [shape: f32[4,4,32], index: 2, kind: input, shape index: {}]   ;;  %s566_s3 = inlined_call_operand.hbm [shape: f32[2,4,128], index: 3, kind: output, shape index: {}]  }
   0x1   :  { %9 = vsyncpa [#allocation6], 0 }
   0x2   :  { %10 = vsyncpa [#allocation4], 0  ;;  %s429_s12 = smov [#allocation5]   ;;  %s430_s14 = smov [#allocation2]  }
   0x3   :  { %s28_s13 = sshll.u32 %s429_s12, 4  ;;  %s16_s15 = sshll.u32 %s430_s14, 4  ;;  %s29_s13 = int_to_ptr.vmem [resolvable:$true] %s28_s13  ;;  %s17_s15 = int_to_ptr.vmem [resolvable:$true] %s16_s15 }
   0x4   :  { %s351_s16 = scalar_lea.vmem %s29_s13, 128  ;;  %p356_p1 = scmp.lt.s32.totalorder %s29_s13, %s29_s13 }
   0x5   :  { %p352_p0 = scmp.ne.s32.totalorder %s29_s13, %s351_s16  ;;  %p357_p2 = scmp.lt.s32.totalorder %s351_s16, %s351_s16 }
   0x7   :  { %p358_p3 = por %p357_p2, %p356_p1 }
   0x9   :  { %p359_p4 = pnand %p358_p3, %p352_p0 }
   0xb   :  { %362 = shalt.err (!%p359_p4)
}
   0xc   :  { %s431_s17 = smov 64   ;;  %s432_s18 = smov 4  }
   0xd   :  { %34 = dma.hbm_to_vmem [thread:$0]  %s564_s1, 128, %s29_s13, [#allocation6], %s431_s17, %s431_s17, %s432_s18  }
   0xe   :  { %s371_s21 = scalar_lea.vmem %s17_s15, 128  ;;  %p376_p6 = scmp.lt.s32.totalorder %s17_s15, %s17_s15 }
   0xf   :  { %p372_p5 = scmp.ne.s32.totalorder %s17_s15, %s371_s21  ;;  %p377_p7 = scmp.lt.s32.totalorder %s371_s21, %s371_s21 }
  0x11   :  { %p378_p8 = por %p377_p7, %p376_p6 }
  0x13   :  { %p379_p9 = pnand %p378_p8, %p372_p5 }
  0x15   :  { %382 = shalt.err (!%p379_p9)
}
  0x16   :  { %22 = dma.hbm_to_vmem [thread:$0]  %s563_s0, 128, %s17_s15, [#allocation3], %s431_s17, %s431_s17, %s432_s18  }
  0x17   :  { %s433_s24 = smov [#allocation7]  }
  0x18   :  { %s40_s25 = sshll.u32 %s433_s24, 4  ;;  %s41_s25 = int_to_ptr.vmem [resolvable:$true] %s40_s25 }
  0x19   :  { %s391_s26 = scalar_lea.vmem %s41_s25, 256  ;;  %p396_p11 = scmp.lt.s32.totalorder %s41_s25, %s41_s25 }
  0x1a   :  { %p392_p10 = scmp.ne.s32.totalorder %s41_s25, %s391_s26  ;;  %p397_p12 = scmp.lt.s32.totalorder %s391_s26, %s391_s26 }
  0x1c   :  { %p398_p13 = por %p397_p12, %p396_p11 }
  0x1e   :  { %p399_p0 = pnand %p398_p13, %p392_p10 }
  0x20   :  { %402 = shalt.err (!%p399_p0)
}
  0x21   :  { %46 = dma.hbm_to_vmem [thread:$0]  %s565_s2, 256, %s41_s25, [#allocation6], %s431_s17, %s431_s17, %s432_s18  }
  0x22   :  { %423 = dma.done.wait [#allocation3], 128  }
  0x23   :  { %424 = vsyncadd [#allocation3], 4294967168 }
  0x24   :  { %425 = dma.done.wait [#allocation6], 384  }
  0x25   :  { %426 = vsyncadd [#allocation6], 4294966912  ;;  %vm113_vm0 = vcmask 1041409   ;;  %vm116_vm1 = vcmask 1042434   ;;  %v475_v0 = vld [vmem:[#allocation2] sm:$0xf] }
  0x26   :  { %vm119_vm2 = vcmask 1043459   ;;  %v191_v1 = vld [vmem:[#allocation7 + $0x2] sm:$0x1]  ;;  %v192_v2 = vld [vmem:[#allocation7 + $0x6] sm:$0x1]  ;;  %v478_v3 = vrot.slane %v475_v0, 1 }
  0x27   :  { %v481_v4 = vrot.slane %v475_v0, 2  ;;  %v484_v5 = vrot.slane %v475_v0, 3  ;;  %v193_v6 = vld [vmem:[#allocation7 + $0xa] sm:$0x1]  ;;  %v197_v7 = vmul.f32 %v191_v1, %v475_v0  ;;  %v194_v8 = vld [vmem:[#allocation7 + $0xe] sm:$0x1] }
  0x28   :  { %v331_v9 = vld [vmem:[#allocation5 + $0x2] ss:$0 sm:$0xff]  ;;  %v132_v10 = vld [vmem:[#allocation7 + $0x1] sm:$0x1]  ;;  %v198_v11 = vmul.f32 %v192_v2, %v478_v3  ;;  %v133_v15 = vld [vmem:[#allocation7 + $0x5] sm:$0x1] }
  0x29   :  { %v199_v12 = vmul.f32 %v193_v6, %v481_v4  ;;  %v200_v13 = vmul.f32 %v194_v8, %v484_v5  ;;  %v213_v14 = vmul.f32 %v331_v9, %v197_v7  ;;  %v134_v16 = vld [vmem:[#allocation7 + $0x9] sm:$0x1]  ;;  %v135_v17 = vld [vmem:[#allocation7 + $0xd] sm:$0x1]  ;;  %v329_v18 = vld [vmem:[#allocation5 + $0x1] ss:$0 sm:$0xff]  ;;  %v138_v19 = vmul.f32 %v132_v10, %v475_v0 }
  0x2a   :  { %v139_v20 = vmul.f32 %v133_v15, %v478_v3  ;;  %v140_v21 = vmul.f32 %v134_v16, %v481_v4  ;;  %v141_v22 = vmul.f32 %v135_v17, %v484_v5  ;;  %v494_v23 = vld [vmem:[#allocation2 + $0x4] sm:$0xf]  ;;  %v214_v24 = vmul.f32 %v331_v9, %v198_v11  ;;  %v332_v40 = vld [vmem:[#allocation5 + $0x6] ss:$0 sm:$0xff]  ;;  %v330_v53 = vld [vmem:[#allocation5 + $0x5] ss:$0 sm:$0xff] }
  0x2b   :  { %v215_v25 = vmul.f32 %v331_v9, %v199_v12  ;;  %v216_v26 = vmul.f32 %v331_v9, %v200_v13  ;;  %v497_v27 = vrot.slane %v494_v23, 1  ;;  %v154_v28 = vmul.f32 %v329_v18, %v138_v19  ;;  %v250_v54 = vld [vmem:[#allocation7 + $0x3] sm:$0x1]  ;;  %v251_v59 = vld [vmem:[#allocation7 + $0x7] sm:$0x1]  ;;  %s434_s0 = smov 32  }
  0x2c   :  { %v155_v29 = vmul.f32 %v329_v18, %v139_v20  ;;  %v156_v30 = vmul.f32 %v329_v18, %v140_v21  ;;  %v157_v31 = vmul.f32 %v329_v18, %v141_v22  ;;  %v229_v32 = vrot.slane %v214_v24, 7  ;;  %v334_v13 = vld [vmem:[#allocation5 + $0x7] ss:$0 sm:$0xff]  ;;  %s435_s2 = smov 96   ;;  %s436_s28 = smov [#allocation8]  }
  0x2d   :  { %v231_v33 = vrot.slane %v215_v25, 6  ;;  %v233_v34 = vrot.slane %v216_v26, 5  ;;  %v500_v35 = vrot.slane %v494_v23, 2  ;;  %v503_v39 = vrot.slane %v494_v23, 3  ;;  %s314_s29 = sshll.u32 %s436_s28, 4  ;;  %s315_s29 = int_to_ptr.vmem [resolvable:$true] %s314_s29 }
  0x2e   :  { %v170_v36 = vrot.slane %v155_v29, 7  ;;  %v172_v37 = vrot.slane %v156_v30, 6  ;;  %v174_v38 = vrot.slane %v157_v31, 5  ;;  %v230_v41 = vsel %vm113_vm0, %v229_v32, %v213_v14  ;;  %v333_v29 = vld [vmem:[#allocation5 + $0x3] ss:$0 sm:$0xff]  ;;  %s403_s30 = scalar_lea.vmem %s315_s29, 128  ;;  %p408_p2 = scmp.lt.s32.totalorder %s315_s29, %s315_s29 }
  0x2f   :  { %v201_v42 = vmul.f32 %v191_v1, %v494_v23  ;;  %v202_v43 = vmul.f32 %v192_v2, %v497_v27  ;;  %v203_v44 = vmul.f32 %v193_v6, %v500_v35  ;;  %v232_v45 = vsel %vm116_vm1, %v231_v33, %v230_v41  ;;  %v252_v1 = vld [vmem:[#allocation7 + $0xb] sm:$0x1]  ;;  %v253_v2 = vld [vmem:[#allocation7 + $0xf] sm:$0x1]  ;;  %p404_p1 = scmp.ne.s32.totalorder %s315_s29, %s403_s30  ;;  %p409_p3 = scmp.lt.s32.totalorder %s403_s30, %s403_s30 }
  0x30   :  { %v171_v46 = vsel %vm113_vm0, %v170_v36, %v154_v28  ;;  %v204_v47 = vmul.f32 %v194_v8, %v503_v39  ;;  %v142_v48 = vmul.f32 %v132_v10, %v494_v23  ;;  %v234_v49 = vsel %vm119_vm2, %v233_v34, %v232_v45  ;;  %v58_v34 = vld [vmem:[#allocation7] sm:$0x1]  ;;  %v60_v36 = vld [vmem:[#allocation7 + $0x8] sm:$0x1] }
  0x31   :  { %v173_v50 = vsel %vm116_vm1, %v172_v37, %v171_v46  ;;  %v217_v51 = vmul.f32 %v332_v40, %v201_v42  ;;  %v218_v52 = vmul.f32 %v332_v40, %v202_v43  ;;  %241 = vrot.lane.b32.xlu1 %v234_v49, %s431_s17  ;;  %v219_v56 = vmul.f32 %v332_v40, %v203_v44  ;;  %v61_v37 = vld [vmem:[#allocation7 + $0xc] sm:$0x1]  ;;  %v59_v49 = vld [vmem:[#allocation7 + $0x4] sm:$0x1]  ;;  %p410_p4 = por %p409_p3, %p408_p2 }
  0x32   :  { %v175_v55 = vsel %vm119_vm2, %v174_v38, %v173_v50  ;;  %v220_v57 = vmul.f32 %v332_v40, %v204_v47  ;;  %v143_v58 = vmul.f32 %v133_v15, %v497_v27  ;;  %v144_v61 = vmul.f32 %v134_v16, %v500_v35  ;;  %v327_v47 = vld [vmem:[#allocation5] ss:$0 sm:$0xff] }
  0x33   :  { %182 = vrot.lane.b32.xlu0 %v175_v55, %s434_s0  ;;  %v235_v60 = vrot.slane %v218_v52, 7  ;;  %v145_v62 = vmul.f32 %v135_v17, %v503_v39  ;;  %v158_v63 = vmul.f32 %v330_v53, %v142_v48  ;;  %v237_v6 = vrot.slane %v219_v56, 6  ;;  %p411_p5 = pnand %p410_p4, %p404_p1 }
  0x34   :  { %v239_v7 = vrot.slane %v220_v57, 5  ;;  %v159_v8 = vmul.f32 %v330_v53, %v143_v58  ;;  %v260_v9 = vmul.f32 %v250_v54, %v494_v23  ;;  %v160_v11 = vmul.f32 %v330_v53, %v144_v61 }
  0x35   :  { %v236_v10 = vsel %vm113_vm0, %v235_v60, %v217_v51  ;;  %v161_v12 = vmul.f32 %v330_v53, %v145_v62  ;;  %v261_v14 = vmul.f32 %v251_v59, %v497_v27  ;;  %v262_v17 = vmul.f32 %v252_v1, %v500_v35  ;;  %v328_v62 = vld [vmem:[#allocation5 + $0x4] ss:$0 sm:$0xff] }
  0x36   :  { %v238_v15 = vsel %vm116_vm1, %v237_v6, %v236_v10  ;;  %v176_v16 = vrot.slane %v159_v8, 7  ;;  %v263_v18 = vmul.f32 %v253_v2, %v503_v39  ;;  %v178_v20 = vrot.slane %v160_v11, 6 }
  0x37   :  { %v240_v19 = vsel %vm119_vm2, %v239_v7, %v238_v15  ;;  %v180_v21 = vrot.slane %v161_v12, 5  ;;  %v276_v22 = vmul.f32 %v334_v13, %v260_v9  ;;  %v277_v25 = vmul.f32 %v334_v13, %v261_v14 }
  0x38   :  { %243 = vrot.lane.b32.xlu1 %v240_v19, %s431_s17  ;;  %v177_v24 = vsel %vm113_vm0, %v176_v16, %v158_v63  ;;  %v278_v26 = vmul.f32 %v334_v13, %v262_v17  ;;  %v279_v28 = vmul.f32 %v334_v13, %v263_v18  ;;  %v256_v31 = vmul.f32 %v250_v54, %v475_v0 }
  0x39   :  { %v179_v30 = vsel %vm116_vm1, %v178_v20, %v177_v24  ;;  %v257_v32 = vmul.f32 %v251_v59, %v478_v3  ;;  %v258_v33 = vmul.f32 %v252_v1, %v481_v4  ;;  %v294_v40 = vrot.slane %v277_v25, 7 }
  0x3a   :  { %v181_v38 = vsel %vm119_vm2, %v180_v21, %v179_v30  ;;  %v296_v41 = vrot.slane %v278_v26, 6  ;;  %v298_v42 = vrot.slane %v279_v28, 5  ;;  %v259_v43 = vmul.f32 %v253_v2, %v484_v5 }
  0x3b   :  { %184 = vrot.lane.b32.xlu0 %v181_v38, %s434_s0  ;;  %v272_v44 = vmul.f32 %v333_v29, %v256_v31  ;;  %v273_v45 = vmul.f32 %v333_v29, %v257_v32  ;;  %v274_v46 = vmul.f32 %v333_v29, %v258_v33  ;;  %v295_v48 = vsel %vm113_vm0, %v294_v40, %v276_v22 }
  0x3c   :  { %v80_v50 = vmul.f32 %v58_v34, %v475_v0  ;;  %v82_v51 = vmul.f32 %v481_v4, %v60_v36  ;;  %v83_v52 = vmul.f32 %v484_v5, %v61_v37  ;;  %v297_v53 = vsel %vm116_vm1, %v296_v41, %v295_v48 }
  0x3d   :  { %v275_v54 = vmul.f32 %v333_v29, %v259_v43  ;;  %v288_v55 = vrot.slane %v273_v45, 7  ;;  %v290_v56 = vrot.slane %v274_v46, 6  ;;  %v299_v57 = vsel %vm119_vm2, %v298_v42, %v297_v53 }
  0x3e   :  { %v98_v58 = vmul.f32 %v327_v47, %v82_v51  ;;  %v99_v59 = vmul.f32 %v327_v47, %v83_v52  ;;  %302 = vrot.lane.b32.xlu1 %v299_v57, %s435_s2  ;;  %v81_v0 = vmul.f32 %v478_v3, %v59_v49  ;;  %v84_v4 = vmul.f32 %v58_v34, %v494_v23 }
  0x3f   :  { %v289_v60 = vsel %vm113_vm0, %v288_v55, %v272_v44  ;;  %v292_v61 = vrot.slane %v275_v54, 5  ;;  %v96_v63 = vmul.f32 %v327_v47, %v80_v50  ;;  %v85_v1 = vmul.f32 %v497_v27, %v59_v49 }
  0x40   :  { %v291_v5 = vsel %vm116_vm1, %v290_v56, %v289_v60  ;;  %v97_v6 = vmul.f32 %v327_v47, %v81_v0  ;;  %v86_v7 = vmul.f32 %v500_v35, %v60_v36  ;;  %v87_v8 = vmul.f32 %v503_v39, %v61_v37 }
  0x41   :  { %v293_v2 = vsel %vm119_vm2, %v292_v61, %v291_v5  ;;  %v115_v9 = vrot.slane %v98_v58, 6  ;;  %v100_v10 = vmul.f32 %v328_v62, %v84_v4  ;;  %v101_v11 = vmul.f32 %v328_v62, %v85_v1 }
  0x42   :  { %300 = vrot.lane.b32.xlu0 %v293_v2, %s435_s2  ;;  %v118_v3 = vrot.slane %v99_v59, 5  ;;  %v112_v12 = vrot.slane %v97_v6, 7  ;;  %v102_v13 = vmul.f32 %v328_v62, %v86_v7  ;;  %v103_v23 = vmul.f32 %v328_v62, %v87_v8 }
  0x43   :  { %v121_v14 = vrot.slane %v101_v11, 7  ;;  %vm129_vm3 = vcmask 257024   ;;  %vm188_vm4 = vcmask 519424   ;;  %vm247_vm5 = vcmask 781824  }
  0x44   :  { %v114_v15 = vsel %vm113_vm0, %v112_v12, %v96_v63  ;;  %v123_v27 = vrot.slane %v102_v13, 6  ;;  %v125_v16 = vrot.slane %v103_v23, 5  ;;  %vm306_vm6 = vcmask 1044224  }
  0x45   :  { %v117_v17 = vsel %vm116_vm1, %v115_v9, %v114_v15  ;;  %v122_v35 = vsel %vm113_vm0, %v121_v14, %v100_v10 }
  0x46   :  { %v120_v39 = vsel %vm119_vm2, %v118_v3, %v117_v17  ;;  %v124_v18 = vsel %vm116_vm1, %v123_v27, %v122_v35 }
  0x47   :  { %130 = vst.msk [vmem:[#allocation8] sm:$0xf] %vm129_vm3, %v120_v39  ;;  %v126_v19 = vsel %vm119_vm2, %v125_v16, %v124_v18 }
  0x48   :  { %131 = vst.msk [vmem:[#allocation8 + $0x4] sm:$0xf] %vm129_vm3, %v126_v19 }
  0xa3   :  { %v242_v20 = vpop.permute.xlu1 %241 }
  0xa5   :  { %v183_v21 = vpop.permute.xlu0 %182 }
  0xa6   :  { %189 = vst.msk [vmem:[#allocation8] sm:$0xf] %vm188_vm4, %v183_v21 }
  0xa7   :  { %248 = vst.msk [vmem:[#allocation8] sm:$0xf] %vm247_vm5, %v242_v20 }
  0xaa   :  { %v244_v22 = vpop.permute.xlu1 %243 }
  0xad   :  { %v185_v24 = vpop.permute.xlu0 %184 }
  0xae   :  { %190 = vst.msk [vmem:[#allocation8 + $0x4] sm:$0xf] %vm188_vm4, %v185_v24 }
  0xaf   :  { %249 = vst.msk [vmem:[#allocation8 + $0x4] sm:$0xf] %vm247_vm5, %v244_v22 }
  0xb0   :  { %v303_v25 = vpop.permute.xlu1 %302 }
  0xb1   :  { %308 = vst.msk [vmem:[#allocation8 + $0x4] sm:$0xf] %vm306_vm6, %v303_v25 }
  0xb4   :  { %v301_v26 = vpop.permute.xlu0 %300 }
  0xb5   :  { %307 = vst.msk [vmem:[#allocation8] sm:$0xf] %vm306_vm6, %v301_v26 }
  0xb6   :  { %414 = shalt.err (!%p411_p5)
}
  0xb7   :  { %320 = dma.vmem_to_hbm [thread:$0]  %s315_s29, 128, %s566_s3, [#allocation4], %s431_s17, %s431_s17, %s432_s18  }
  0xb8   :  { %427 = dma.done.wait [#allocation4], 128  }
  0xb9   :  { %428 = vsyncadd [#allocation4], 4294967168 }
  0xba   :  { %324 = vsyncpa [#allocation3], 1 }
  0xbb   :  { %325 = vsyncpa [#allocation6], 1 }
  0xbc   :  { %326 = vsyncpa [#allocation4], 1 }

</bundles_post_ra>
